<compile_context>
chip_gen: v7x
topology: tpu7x:2x2x1
jax: 0.10.0
libtpu: 0.0.40
codegen_flags: <defaults>
</compile_context>

<pallas_src>
import functools

import jax
import jax.numpy as jnp
from jax.experimental import pallas as pl
from jax.experimental.pallas import tpu as pltpu


def _round_up(x: int, m: int) -> int:
    return ((x + m - 1) // m) * m


def _fc_policy_kernel(x_ref, w1_ref, b1_ref, w2_ref, b2_ref,
                      rand_ref, mask_ref, out_ref):
    # x_ref:    (TB, in_dim)       observations tile
    # w1_ref:   (in_dim, hidden)   first linear weight   (resident across grid)
    # b1_ref:   (1, hidden)
    # w2_ref:   (hidden, out_dim)  second linear weight  (resident across grid)
    # b2_ref:   (1, out_dim)
    # rand_ref: (TB, 1) int32      random actions
    # mask_ref: (TB, 1) int32      1 -> take random action, 0 -> greedy
    # out_ref:  (TB, 1) int32      chosen actions
    x = x_ref[...].astype(jnp.float32)

    # Layer 1: x @ W1 + b1, ReLU  (MXU, f32 accumulation)
    h = jnp.dot(x, w1_ref[...], preferred_element_type=jnp.float32)
    h = jnp.maximum(h + b1_ref[...], 0.0)

    # Layer 2 (Linear0): h @ W2 + b2
    logits = jnp.dot(h, w2_ref[...], preferred_element_type=jnp.float32)
    logits = logits + b2_ref[...]

    # argmax over the action dim (first occurrence, matching torch.argmax).
    out_dim = logits.shape[-1]
    col = jax.lax.broadcasted_iota(jnp.int32, logits.shape, 1)
    row_max = jnp.max(logits, axis=-1, keepdims=True)
    masked_idx = jnp.where(logits == row_max, col, jnp.int32(out_dim))
    greedy = jnp.min(masked_idx, axis=-1, keepdims=True)        # (TB, 1) i32

    # epsilon-greedy select.
    out_ref[...] = jnp.where(mask_ref[...] != 0, rand_ref[...], greedy)


@functools.partial(jax.jit, static_argnames=("epsilon",))
def fc_policy_forward(obs, w1, b1, w2, b2, key, *, epsilon: float = 0.1):
    """Returns int32 actions of shape (batch,) — epsilon-greedy over the MLP."""
    obs = jnp.asarray(obs)
    B, in_dim = obs.shape
    hidden_dim = w1.shape[1]
    out_dim = w2.shape[1]

    # Randomness matching the torch semantics (randint + uniform < epsilon).
    # TODO(synk): torch's RNG bit-stream is not reproducible in JAX; the
    # distribution/semantics are identical.
    k_rand, k_pick = jax.random.split(key)
    rand_vals = jax.random.randint(k_rand, (B,), 0, out_dim, dtype=jnp.int32)
    pick_rand = (jax.random.uniform(k_pick, (B,)) < epsilon).astype(jnp.int32)

    # Batch tiling: multiple-of-8 tiles, capped at 256 rows so the
    # double-buffered blocks + resident weights stay far under v7x's 64 MiB
    # VMEM while still giving a multi-step grid for larger batches.
    TB = min(256, _round_up(B, 8))
    B_pad = _round_up(B, TB)

    obs_p = obs
    rand_p = rand_vals.reshape(B, 1)
    mask_p = pick_rand.reshape(B, 1)
    if B_pad != B:
        pad = B_pad - B
        obs_p = jnp.pad(obs_p, ((0, pad), (0, 0)))
        rand_p = jnp.pad(rand_p, ((0, pad), (0, 0)))
        mask_p = jnp.pad(mask_p, ((0, pad), (0, 0)))

    w1_f = w1.astype(jnp.float32)
    w2_f = w2.astype(jnp.float32)
    b1_2d = b1.reshape(1, hidden_dim).astype(jnp.float32)
    b2_2d = b2.reshape(1, out_dim).astype(jnp.float32)

    grid = (B_pad // TB,)
    out = pl.pallas_call(
        _fc_policy_kernel,
        out_shape=jax.ShapeDtypeStruct((B_pad, 1), jnp.int32),
        grid_spec=pltpu.PrefetchScalarGridSpec(
            num_scalar_prefetch=0,
            grid=grid,
            in_specs=[
                pl.BlockSpec((TB, in_dim), lambda i: (i, 0)),           # obs
                pl.BlockSpec((in_dim, hidden_dim), lambda i: (0, 0)),   # W1
                pl.BlockSpec((1, hidden_dim), lambda i: (0, 0)),        # b1
                pl.BlockSpec((hidden_dim, out_dim), lambda i: (0, 0)),  # W2
                pl.BlockSpec((1, out_dim), lambda i: (0, 0)),           # b2
                pl.BlockSpec((TB, 1), lambda i: (i, 0)),                # rand
                pl.BlockSpec((TB, 1), lambda i: (i, 0)),                # mask
            ],
            out_specs=pl.BlockSpec((TB, 1), lambda i: (i, 0)),
        ),
        compiler_params=pltpu.CompilerParams(
            # Batch tiles are independent -> shard across v7x's two TCs.
            dimension_semantics=("parallel",),
        ),
    )(obs_p, w1_f, b1_2d, w2_f, b2_2d, rand_p, mask_p)

    return out[:B, 0]


if __name__ == "__main__":
    key = jax.random.PRNGKey(0)
    batch, in_dim, hidden_dim, out_dim = 2, 16, 32, 4
    k_obs, k_w1, k_b1, k_w2, k_b2, k_act = jax.random.split(key, 6)

    obs = jax.random.normal(k_obs, (batch, in_dim), dtype=jnp.float32)
    # NOTE: Linear0 differs from Linear only in init; random weights here so
    # the matmul/argmax path is actually exercised by the check.
    w1 = jax.random.normal(k_w1, (in_dim, hidden_dim), jnp.float32) * 0.1
    b1 = jax.random.normal(k_b1, (hidden_dim,), jnp.float32) * 0.1
    w2 = jax.random.normal(k_w2, (hidden_dim, out_dim), jnp.float32) * 0.1
    b2 = jax.random.normal(k_b2, (out_dim,), jnp.float32) * 0.1

    actions = fc_policy_forward(obs, w1, b1, w2, b2, k_act)
    actions = jax.block_until_ready(actions)

    # Pure-JAX reference with identical RNG keys / splits.
    h_ref = jnp.maximum(obs @ w1 + b1, 0.0)
    logits_ref = h_ref @ w2 + b2
    greedy_ref = jnp.argmax(logits_ref, axis=1).astype(jnp.int32)
    kr, kp = jax.random.split(k_act)
    rand_ref = jax.random.randint(kr, (batch,), 0, out_dim, dtype=jnp.int32)
    pick_ref = jax.random.uniform(kp, (batch,)) < 0.1
    ref = jnp.where(pick_ref, rand_ref, greedy_ref)

    assert actions.shape == (batch,) and actions.dtype == jnp.int32
    assert jnp.array_equal(actions, ref)
    print("KERNEL_OK")
</pallas_src>

<mosaic_0001>
module attributes {stable_mosaic.version = 11 : i64} {
  func.func @_fc_policy_kernel(%arg0: i32, %arg1: memref<8x16xf32, #tpu.memory_space<vmem>>, %arg2: memref<16x32xf32, #tpu.memory_space<vmem>>, %arg3: memref<1x32xf32, #tpu.memory_space<vmem>>, %arg4: memref<32x4xf32, #tpu.memory_space<vmem>>, %arg5: memref<1x4xf32, #tpu.memory_space<vmem>>, %arg6: memref<8x1xi32, #tpu.memory_space<vmem>>, %arg7: memref<8x1xi32, #tpu.memory_space<vmem>>, %arg8: memref<8x1xi32, #tpu.memory_space<vmem>>) attributes {dimension_semantics = [#tpu.dimension_semantics<parallel>], iteration_bounds = array<i64: 1>, scalar_prefetch = 0 : i64, scratch_operands = 0 : i64, tpu.core_type = #tpu.core_type<tc>, window_params = [{transform_indices = @transform_0, window_bounds = array<i64: 8, 16>}, {pipeline_mode = #tpu.pipeline_mode<synchronous>, transform_indices = @transform_1, window_bounds = array<i64: 16, 32>}, {pipeline_mode = #tpu.pipeline_mode<synchronous>, transform_indices = @transform_2, window_bounds = array<i64: 1, 32>}, {pipeline_mode = #tpu.pipeline_mode<synchronous>, transform_indices = @transform_3, window_bounds = array<i64: 32, 4>}, {pipeline_mode = #tpu.pipeline_mode<synchronous>, transform_indices = @transform_4, window_bounds = array<i64: 1, 4>}, {transform_indices = @transform_5, window_bounds = array<i64: 8, 1>}, {transform_indices = @transform_6, window_bounds = array<i64: 8, 1>}, {transform_indices = @transform_7, window_bounds = array<i64: 8, 1>}]} {
    %c0 = arith.constant 0 : index
    %c0_0 = arith.constant 0 : index
    %0 = vector.load %arg1[%c0, %c0_0] : memref<8x16xf32, #tpu.memory_space<vmem>>, vector<8x16xf32>
    %c0_1 = arith.constant 0 : index
    %c0_2 = arith.constant 0 : index
    %1 = vector.load %arg2[%c0_1, %c0_2] : memref<16x32xf32, #tpu.memory_space<vmem>>, vector<16x32xf32>
    %cst = arith.constant dense<0.000000e+00> : vector<8x32xf32>
    %2 = tpu.matmul %0, %1, %cst {dimension_numbers = #tpu.dot_dimension_numbers<[1], [0], [0], [1], [0, 0, 1, 1], [], []>} : vector<8x16xf32>, vector<16x32xf32>, vector<8x32xf32> -> vector<8x32xf32>
    %c0_3 = arith.constant 0 : index
    %c0_4 = arith.constant 0 : index
    %3 = vector.load %arg3[%c0_3, %c0_4] : memref<1x32xf32, #tpu.memory_space<vmem>>, vector<1x32xf32>
    %4 = vector.broadcast %3 : vector<1x32xf32> to vector<8x32xf32>
    %5 = arith.addf %2, %4 : vector<8x32xf32>
    %cst_5 = arith.constant 0.000000e+00 : f32
    %6 = vector.broadcast %cst_5 : f32 to vector<8x32xf32>
    %7 = arith.maximumf %5, %6 : vector<8x32xf32>
    %c0_6 = arith.constant 0 : index
    %c0_7 = arith.constant 0 : index
    %8 = vector.load %arg4[%c0_6, %c0_7] : memref<32x4xf32, #tpu.memory_space<vmem>>, vector<32x4xf32>
    %cst_8 = arith.constant dense<0.000000e+00> : vector<8x4xf32>
    %9 = tpu.matmul %7, %8, %cst_8 {dimension_numbers = #tpu.dot_dimension_numbers<[1], [0], [0], [1], [0, 0, 1, 1], [], []>} : vector<8x32xf32>, vector<32x4xf32>, vector<8x4xf32> -> vector<8x4xf32>
    %c0_9 = arith.constant 0 : index
    %c0_10 = arith.constant 0 : index
    %10 = vector.load %arg5[%c0_9, %c0_10] : memref<1x4xf32, #tpu.memory_space<vmem>>, vector<1x4xf32>
    %11 = vector.broadcast %10 : vector<1x4xf32> to vector<8x4xf32>
    %12 = arith.addf %9, %11 : vector<8x4xf32>
    %13 = tpu.iota {dimensions = array<i32: 1>} : vector<8x4xi32>
    %cst_11 = arith.constant dense<0xFF800000> : vector<8xf32>
    %14 = vector.multi_reduction <maximumf>, %12, %cst_11 [1] : vector<8x4xf32> to vector<8xf32>
    %15 = vector.shape_cast %14 : vector<8xf32> to vector<8x1xf32>
    %16 = vector.broadcast %15 : vector<8x1xf32> to vector<8x4xf32>
    %17 = arith.cmpf oeq, %12, %16 : vector<8x4xf32>
    %c4_i32 = arith.constant 4 : i32
    %18 = vector.broadcast %c4_i32 : i32 to vector<8x4xi32>
    %19 = arith.select %17, %13, %18 : vector<8x4xi1>, vector<8x4xi32>
    %cst_12 = arith.constant dense<2147483647> : vector<8xi32>
    %20 = vector.multi_reduction <minsi>, %19, %cst_12 [1] : vector<8x4xi32> to vector<8xi32>
    %21 = vector.shape_cast %20 : vector<8xi32> to vector<8x1xi32>
    %c0_13 = arith.constant 0 : index
    %c0_14 = arith.constant 0 : index
    %22 = vector.load %arg7[%c0_13, %c0_14] : memref<8x1xi32, #tpu.memory_space<vmem>>, vector<8x1xi32>
    %c0_i32 = arith.constant 0 : i32
    %23 = vector.broadcast %c0_i32 : i32 to vector<8x1xi32>
    %24 = arith.cmpi ne, %22, %23 : vector<8x1xi32>
    %c0_15 = arith.constant 0 : index
    %c0_16 = arith.constant 0 : index
    %25 = vector.load %arg6[%c0_15, %c0_16] : memref<8x1xi32, #tpu.memory_space<vmem>>, vector<8x1xi32>
    %26 = arith.select %24, %25, %21 : vector<8x1xi1>, vector<8x1xi32>
    %c0_17 = arith.constant 0 : index
    %c0_18 = arith.constant 0 : index
    %27 = vector.load %arg8[%c0_17, %c0_18] : memref<8x1xi32, #tpu.memory_space<vmem>>, vector<8x1xi32>
    tpu.vector_store %arg8[%c0_17, %c0_18], %26 {strides = array<i32>} : memref<8x1xi32, #tpu.memory_space<vmem>>, vector<8x1xi32>,
    return
  }
  func.func @transform_0(%arg0: i32) -> (i32, i32) {
    %c0_i32 = arith.constant 0 : i32
    %c0_i32_0 = arith.constant 0 : i32
    return %arg0, %c0_i32 : i32, i32
  }
  func.func @transform_1(%arg0: i32) -> (i32, i32) {
    %c0_i32 = arith.constant 0 : i32
    %c0_i32_0 = arith.constant 0 : i32
    %c0_i32_1 = arith.constant 0 : i32
    return %c0_i32, %c0_i32_0 : i32, i32
  }
  func.func @transform_2(%arg0: i32) -> (i32, i32) {
    %c0_i32 = arith.constant 0 : i32
    %c0_i32_0 = arith.constant 0 : i32
    %c0_i32_1 = arith.constant 0 : i32
    return %c0_i32, %c0_i32_0 : i32, i32
  }
  func.func @transform_3(%arg0: i32) -> (i32, i32) {
    %c0_i32 = arith.constant 0 : i32
    %c0_i32_0 = arith.constant 0 : i32
    %c0_i32_1 = arith.constant 0 : i32
    return %c0_i32, %c0_i32_0 : i32, i32
  }
  func.func @transform_4(%arg0: i32) -> (i32, i32) {
    %c0_i32 = arith.constant 0 : i32
    %c0_i32_0 = arith.constant 0 : i32
    %c0_i32_1 = arith.constant 0 : i32
    return %c0_i32, %c0_i32_0 : i32, i32
  }
  func.func @transform_5(%arg0: i32) -> (i32, i32) {
    %c0_i32 = arith.constant 0 : i32
    %c0_i32_0 = arith.constant 0 : i32
    return %arg0, %c0_i32 : i32, i32
  }
  func.func @transform_6(%arg0: i32) -> (i32, i32) {
    %c0_i32 = arith.constant 0 : i32
    %c0_i32_0 = arith.constant 0 : i32
    return %arg0, %c0_i32 : i32, i32
  }
  func.func @transform_7(%arg0: i32) -> (i32, i32) {
    %c0_i32 = arith.constant 0 : i32
    %c0_i32_0 = arith.constant 0 : i32
    return %arg0, %c0_i32 : i32, i32
  }
}

</mosaic_0001>

<bundles_post_ra>
// kernel: fc_policy_forward.21
= control target key start
LH: loop header
LB: loop body
LE: loop exit
PB: predicated region body
PF: predicated region fallthrough
CT: control target
= control target key end

     0   :  { %v271_v0 = vmov 0.0|0.0   ;;  %vm272_vm0 = vmmov 0   ;;  %v273_v3 = vmov 0.0   ;;  %vm36_vm1 = vcmask 130048   ;;  %s350_s1 = inlined_call_operand.vmem [shape: f32[16,32], index: 1, kind: input, shape index: {}]   ;;  %s351_s3 = inlined_call_operand.vmem [shape: f32[32,4], index: 3, kind: input, shape index: {}]   ;;  %s352_s0 = inlined_call_operand.vmem [shape: f32[8,16], index: 0, kind: input, shape index: {}]   ;;  %s353_s2 = inlined_call_operand.vmem [shape: f32[1,32], index: 2, kind: input, shape index: {}]   ;;  %s354_s4 = inlined_call_operand.vmem [shape: f32[1,4], index: 4, kind: input, shape index: {}]   ;;  %s355_s6 = inlined_call_operand.vmem [shape: s32[8,1], index: 6, kind: input, shape index: {}]   ;;  %s356_s5 = inlined_call_operand.vmem [shape: s32[8,1], index: 5, kind: input, shape index: {}]   ;;  %s357_s7 = inlined_call_operand.vmem [shape: s32[8,1], index: 7, kind: output, shape index: {}]  }
   0x1   :  { %259 = vmatprep.subr.bf16.mxu0 %v271_v0  ;;  %v27_v1 = vld [vmem:[%s350_s1] sm:$0xff]  ;;  %v28_v2 = vld [vmem:[%s350_s1 + $0x8] sm:$0xff]  ;;  %245 = vmatprep.mubr.msk.f32.mxu0 %vm272_vm0, %v273_v3  ;;  %v113_v9 = vld [vmem:[%s351_s3 + $0x10] sm:$0xff]  ;;  %vm122_vm2 = vcmask 261120   ;;  %vm198_vm3 = vcmask 31744   ;;  %v196_v22 = vlaneseq  ;;  %vm223_vm7 = vcmask 7168  }
   0x2   :  { %v260_v4 = vpack.c.bf16 %v28_v2, %v27_v1  ;;  %262 = vmatprep.subr.bf16.mxu1 %v271_v0  ;;  %v111_v5 = vld [vmem:[%s351_s3] sm:$0xff]  ;;  %v112_v6 = vld [vmem:[%s351_s3 + $0x8] sm:$0xff]  ;;  %256 = vmatprep.mubr.msk.f32.mxu1 %vm272_vm0, %v273_v3  ;;  %v114_v10 = vld [vmem:[%s351_s3 + $0x18] sm:$0xff] }
   0x3   :  { %v263_v7 = vpack.c.bf16 %v112_v6, %v111_v5  ;;  %v26_v8 = vld [vmem:[%s352_s0] sm:$0xff]  ;;  %v266_v11 = vpack.c.bf16 %v114_v10, %v113_v9  ;;  %v197_v23 = vand.u32 127, %v196_v22 }
   0x4   :  { %261 = vmatpush3.bf16.msra.mxu0 %v260_v4  ;;  %v229_v12 = vld [vmem:[%s353_s2] ss:$0 sm:$0xff] }
   0x5   :  { %264 = vmatpush3.bf16.msra.mxu1 %v263_v7  ;;  %v231_v17 = vld [vmem:[%s354_s4] ss:$0 sm:$0xff] }
   0x6   :  { %265 = vmatprep.subr.bf16.mxu1 %v271_v0  ;;  %v219_v34 = vld [vmem:[%s355_s6] sm:$0xff] }
   0x7   :  { %246 = vmatmul.mubr.msk.f32.vlgmr.msra.gmra.mrb[0].mxu0 %vm36_vm1, %v26_v8  ;;  %vm220_vm6 = vcmp.ne.s32.totalorder %v219_v34, 0  ;;  %v221_v38 = vld [vmem:[%s356_s5] sm:$0xff] }
   0x9   :  { %267 = vmatpush3.bf16.msra.mxu1 %v266_v11 }
  0xda   :  { %v106_v13 = vpop.f32.mrb[0].mxu0 }
  0xdb   :  { %v107_v14 = vadd.f32 %v229_v12, %v106_v13  ;;  %v247_v15 = vpop.f32.mrb[1].mxu0 }
  0xdd   :  { %v110_v16 = vmax.f32 %v107_v14, 0.0 }
  0xdf   :  { %257 = vmatmul.mubr.msk.f32.vlgmr.msra.gmra.mrb[0].mxu1 %vm122_vm2, %v110_v16 }
 0x1b2   :  { %v192_v18 = vpop.f32.mrb[0].mxu1 }
 0x1b3   :  { %v193_v19 = vadd.f32 %v231_v17, %v192_v18  ;;  %v258_v20 = vpop.f32.mrb[1].mxu1 }
 0x1b5   :  { %v199_v21 = vsel %vm198_vm3, %v193_v19, -inf }
 0x1b6   :  { %200 = vmax.xlane.f32.xlu0 %v199_v21 }
 0x243   :  { %v201_v24 = vpop.xlane.xlu0 %200 }
 0x244   :  { %vm202_vm4 = vcmp.eq.f32.partialorder %v193_v19, %v201_v24 }
 0x245   :  { %v203_v25 = vsel %vm202_vm4, %v197_v23, 4 }
 0x246   :  { %v204_v26 = vsel %vm198_vm3, %v203_v25, 2147483647 }
 0x247   :  { %v206_v27 = vshra.s32 %v204_v26, 16  ;;  %v205_v29 = vand.u32 65535, %v204_v26 }
 0x249   :  { %v208_v28 = vcvt.s32.f32 %v206_v27  ;;  %v207_v31 = vcvt.s32.f32 %v205_v29 }
 0x24b   :  { %209 = vmin.xlane.f32.xlu0 %v208_v28 }
 0x2d8   :  { %v210_v30 = vpop.xlane.xlu0 %209 }
 0x2d9   :  { %vm211_vm5 = vcmp.eq.f32.partialorder %v208_v28, %v210_v30  ;;  %v216_v33 = vcvt.f32.s32 %v210_v30 }
 0x2da   :  { %v212_v32 = vsel %vm211_vm5, %v207_v31, inf }
 0x2db   :  { %213 = vmin.xlane.f32.xlu1 %v212_v32  ;;  %v217_v36 = vshll.u32 %v216_v33, 16 }
 0x368   :  { %v214_v35 = vpop.xlane.xlu1 %213 }
 0x369   :  { %v215_v37 = vcvt.f32.s32 %v214_v35 }
 0x36b   :  { %v218_v39 = vadd.s32 %v217_v36, %v215_v37 }
 0x36d   :  { %v222_v40 = vsel %vm220_vm6, %v221_v38, %v218_v39 }
 0x36e   :  { %224 = vst.msk [vmem:[%s357_s7] sm:$0xff] %vm223_vm7, %v222_v40 }

</bundles_post_ra>
